<compile_context>
chip_gen: v7x
topology: tpu7x:2x2x1
jax: 0.10.0
libtpu: 0.0.40
codegen_flags: <defaults>
</compile_context>

<pallas_src>
import functools
import math

import jax
import jax.numpy as jnp
from jax.experimental import pallas as pl
from jax.experimental.pallas import tpu as pltpu

_IGNORE_INDEX = 100000


def _nmt_loss_kernel(x_ref, lbl_ref, out_ref,
                     m_sc, se_sc, ws_sc, acc_sc, *,
                     label_smoothing, V, N, tm, tv, v_steps, row_steps):
    c = pl.program_id(0)          # core axis ("parallel")
    i = pl.program_id(1)          # row-tile axis (reduction into scalar)
    j = pl.program_id(2)          # vocab-chunk axis (online LSE reduction)

    chunked = v_steps > 1
    ragged_v = chunked and (V % tv != 0)

    @pl.when((i == 0) & (j == 0))
    def _():
        acc_sc[...] = jnp.zeros_like(acc_sc)

    @pl.when(j == 0)
    def _():
        m_sc[...] = jnp.full_like(m_sc, -jnp.inf)
        se_sc[...] = jnp.zeros_like(se_sc)
        ws_sc[...] = jnp.zeros_like(ws_sc)

    x = x_ref[...]                                   # (tm, tv) native dtype (bf16 stays bf16)
    labels = lbl_ref[...]                            # (tm, 1) int32

    col = jax.lax.broadcasted_iota(jnp.int32, x.shape, 1)
    if chunked:
        col = col + j * tv
    is_label = col == labels

    # Running row max computed on the native dtype block (bf16 VPU on v6e/v7x).
    if ragged_v:
        col_ok = col < V
        x_max_in = jnp.where(col_ok, x, -jnp.inf)
    else:
        x_max_in = x
    chunk_max = jnp.max(x_max_in, axis=-1, keepdims=True).astype(jnp.float32)
    m_old = m_sc[...]
    m_new = jnp.maximum(m_old, chunk_max)

    # Widen to f32 only for the exp / weighted-sum accumulation.
    xf = x.astype(jnp.float32)
    if ragged_v:
        x_lse = jnp.where(col_ok, xf, -jnp.inf)
    else:
        x_lse = xf
    e = jnp.exp(x_lse - m_new)
    se_sc[...] = se_sc[...] * jnp.exp(m_old - m_new) + jnp.sum(e, axis=-1, keepdims=True)
    m_sc[...] = m_new

    if label_smoothing > 0.0:
        confidence = 1.0 - label_smoothing
        smooth = label_smoothing / (V - 1)
        # Single fused weighted reduction: sum_j target_j * x_j
        w = jnp.where(is_label, jnp.float32(confidence), jnp.float32(smooth))
        if ragged_v:
            xw = jnp.where(col_ok, xf, 0.0) * w
        else:
            xw = xf * w
        ws_sc[...] += jnp.sum(xw, axis=-1, keepdims=True)
    else:
        # x[label] accumulator (garbage rows masked at finalize).
        ws_sc[...] += jnp.sum(jnp.where(is_label, xf, 0.0), axis=-1, keepdims=True)

    @pl.when(j == v_steps - 1)
    def _():
        lse = jnp.log(se_sc[...]) + m_sc[...]                       # (tm, 1)
        row_in_tile = jax.lax.broadcasted_iota(jnp.int32, (tm, 1), 0)
        global_row = (c * row_steps + i) * tm + row_in_tile
        row_valid = global_row < N
        if label_smoothing > 0.0:
            confidence = 1.0 - label_smoothing
            smooth = label_smoothing / (V - 1)
            # sum_j target_j * log(target_j): compile-time constant (0*log0 == 0).
            k_const = 0.0
            if confidence > 0.0:
                k_const += confidence * math.log(confidence)
            if smooth > 0.0:
                k_const += (V - 1) * smooth * math.log(smooth)
            # row KL = K_const + lse - sum_j target_j * x_j   (sum_j target_j == 1)
            row_loss = k_const + lse - ws_sc[...]
            row_loss = jnp.where(row_valid, row_loss, 0.0)
        else:
            valid = (labels != _IGNORE_INDEX) & row_valid
            row_loss = jnp.where(valid, lse - ws_sc[...], 0.0)      # == -scores[i, label_i]
        acc_sc[...] += row_loss

    @pl.when((i == row_steps - 1) & (j == v_steps - 1))
    def _():
        out_ref[...] = jnp.sum(acc_sc[...], keepdims=True)


def _tpu_vmem_capacity_bytes():
    try:
        info = pltpu.get_tpu_info()
        for attr in ("vmem_capacity_bytes", "vmem_bytes", "vmem_size_bytes"):
            v = getattr(info, attr, None)
            if v:
                return int(v)
    except Exception:
        pass
    return 64 << 20     # conservative fallback (v7x-sized VMEM)


def nmt_criterion_loss(dec_outs, labels, label_smoothing=0.0,
                       tm=None, tv=None, num_cores=None):
    """Pallas implementation of NMTCritierion.forward.

    dec_outs: (N, V) float array of decoder logits (f32 or bf16).
    labels:   (N,) integer class ids (100000 == ignore for the NLL path).
    Returns a scalar float32 loss (summed over all rows).
    """
    N, V = dec_outs.shape
    itemsize = jnp.dtype(dec_outs.dtype).itemsize

    # --- per-generation budgets --------------------------------------------------
    vmem_cap = _tpu_vmem_capacity_bytes()
    small_vmem = vmem_cap < (100 << 20)                    # v7x (64 MiB) vs v5e/v6e (128 MiB)
    vmem_budget = (48 << 20) if small_vmem else (96 << 20)
    target_block_bytes = (4 << 20) if small_vmem else (7 << 20)
    tile_budget = vmem_budget - (4 << 20)                  # headroom for labels/scratch/misc
    bytes_per_elem = 2 * itemsize + 4 * 4                  # 2x dbuf input + ~4 f32 temporaries

    n16 = max(16, ((N + 15) // 16) * 16)

    # --- tile selection ----------------------------------------------------------
    if tv is None:
        tm_probe = 16 if tm is None else tm
        if tm_probe * V * bytes_per_elem <= tile_budget:
            tv = V                                          # full-vocab blocks
        else:                                               # vocab-chunked online-LSE path
            tv = max(128, (tile_budget // (tm_probe * bytes_per_elem)) // 128 * 128)
            tv = min(tv, V)
    assert tv == V or tv % 128 == 0, "tv must be V or a multiple of 128"

    if tm is None:
        per_row_bytes = tv * bytes_per_elem
        tm_fit = max(16, tile_budget // per_row_bytes)
        tm_tgt = max(16, target_block_bytes // max(1, tv * itemsize))
        tm = int(min(tm_fit, tm_tgt, 4096, n16))
        tm = max(16, (tm // 16) * 16)
    assert tm % 16 == 0 and tm >= 16

    total_row_blocks = int(pl.cdiv(N, tm))
    v_steps = int(pl.cdiv(V, tv))
    if num_cores is None:
        num_cores = 2 if small_vmem else 1                  # v7x has 2 TensorCores
    num_cores = max(1, min(int(num_cores), total_row_blocks))
    row_steps = int(pl.cdiv(total_row_blocks, num_cores))
    last_row_block = total_row_blocks - 1

    labels2d = labels.reshape(-1).astype(jnp.int32).reshape(N, 1)

    # --- vmem limit & cost hint ---------------------------------------------------
    in_block = tm * tv * itemsize
    f32_block = tm * tv * 4
    lbl_block = tm * 128 * 4                                # lane-padded labels block
    est = 2 * in_block + 2 * lbl_block + 4 * f32_block + (1 << 20)
    vmem_limit = int(min(vmem_budget, max(32 << 20, est)))

    cost = pl.CostEstimate(
        flops=8 * N * V,
        transcendentals=N * V + 2 * N,
        bytes_accessed=N * V * itemsize + N * 4 + num_cores * 4)

    kernel = functools.partial(
        _nmt_loss_kernel, label_smoothing=float(label_smoothing),
        V=V, N=N, tm=tm, tv=tv, v_steps=v_steps, row_steps=row_steps)

    def _row_block(c, i):
        # Clamp so no block starts out of bounds; redundant rows are masked in-kernel.
        return jnp.minimum(c * row_steps + i, last_row_block)

    partials = pl.pallas_call(
        kernel,
        out_shape=jax.ShapeDtypeStruct((num_cores, 1), jnp.float32),
        grid_spec=pltpu.PrefetchScalarGridSpec(
            num_scalar_prefetch=0,
            grid=(num_cores, row_steps, v_steps),
            in_specs=[
                pl.BlockSpec((tm, tv), lambda c, i, j: (_row_block(c, i), j)),   # logits tile
                pl.BlockSpec((tm, 1), lambda c, i, j: (_row_block(c, i), 0)),    # labels tile
            ],
            out_specs=pl.BlockSpec((1, 1), lambda c, i, j: (c, 0)),              # per-core partial
            scratch_shapes=[pltpu.VMEM((tm, 1), jnp.float32)] * 4,               # m, sumexp, wsum, acc
        ),
        compiler_params=pltpu.CompilerParams(
            dimension_semantics=("parallel", "arbitrary", "arbitrary"),
            vmem_limit_bytes=vmem_limit,
        ),
        cost_estimate=cost,
    )(dec_outs, labels2d)
    return jnp.sum(partials)


def _reference_loss(dec_outs, labels, label_smoothing):
    """Pure-JAX reference mirroring the PyTorch module."""
    x = dec_outs.astype(jnp.float32)
    scores = jax.nn.log_softmax(x, axis=-1)
    N, V = x.shape
    if label_smoothing > 0:
        confidence = 1.0 - label_smoothing
        smooth = label_smoothing / (V - 1)
        target = jnp.full((N, V), smooth, jnp.float32)
        target = target.at[jnp.arange(N), labels].set(confidence)
        tlogt = jnp.where(target > 0, target * jnp.log(target), 0.0)
        return jnp.sum(tlogt - target * scores)
    else:
        valid = labels != _IGNORE_INDEX
        safe = jnp.where(valid, labels, 0)
        picked = jnp.take_along_axis(scores, safe[:, None], axis=1)[:, 0]
        return jnp.sum(jnp.where(valid, -picked, 0.0))


if __name__ == "__main__":
    key = jax.random.PRNGKey(0)
    k1, k2, k3, k4, k5, k6 = jax.random.split(key, 6)

    # --- small case: 16 flattened tokens, vocab 128, f32, auto tiling ---
    N, V = 16, 128
    dec_outs = jax.random.normal(k1, (N, V), dtype=jnp.float32)
    labels = jax.random.randint(k2, (N,), 0, V, dtype=jnp.int32)

    loss_smooth = jax.block_until_ready(
        nmt_criterion_loss(dec_outs, labels, label_smoothing=0.1))
    ref_smooth = _reference_loss(dec_outs, labels, 0.1)
    assert jnp.allclose(loss_smooth, ref_smooth, rtol=1e-4, atol=1e-3), (
        loss_smooth, ref_smooth)

    labels_nll = labels.at[3].set(_IGNORE_INDEX).at[7].set(_IGNORE_INDEX)
    loss_nll = jax.block_until_ready(
        nmt_criterion_loss(dec_outs, labels_nll, label_smoothing=0.0))
    ref_nll = _reference_loss(dec_outs, labels_nll, 0.0)
    assert jnp.allclose(loss_nll, ref_nll, rtol=1e-4, atol=1e-3), (loss_nll, ref_nll)

    # --- ragged-N case (no host-side padding), multi-step rows, explicit
    #     2-core axis, bf16 input path ---
    N2, V2 = 200, 256
    dec2 = jax.random.normal(k3, (N2, V2), dtype=jnp.float32).astype(jnp.bfloat16)
    lbl2 = jax.random.randint(k4, (N2,), 0, V2, dtype=jnp.int32)
    lbl2_nll = lbl2.at[0].set(_IGNORE_INDEX).at[199].set(_IGNORE_INDEX)

    loss2_s = jax.block_until_ready(
        nmt_criterion_loss(dec2, lbl2, label_smoothing=0.1, tm=16, num_cores=2))
    ref2_s = _reference_loss(dec2, lbl2, 0.1)
    assert jnp.allclose(loss2_s, ref2_s, rtol=2e-4, atol=1e-2), (loss2_s, ref2_s)

    loss2_n = jax.block_until_ready(
        nmt_criterion_loss(dec2, lbl2_nll, label_smoothing=0.0, tm=16, num_cores=2))
    ref2_n = _reference_loss(dec2, lbl2_nll, 0.0)
    assert jnp.allclose(loss2_n, ref2_n, rtol=2e-4, atol=1e-2), (loss2_n, ref2_n)

    # auto tiling on the same ragged bf16 data (single big row block)
    loss2_auto = jax.block_until_ready(nmt_criterion_loss(dec2, lbl2, 0.1))
    assert jnp.allclose(loss2_auto, ref2_s, rtol=2e-4, atol=1e-2), (loss2_auto, ref2_s)

    # --- vocab-chunked online-LSE path (ragged V and ragged N), f32 ---
    N3, V3 = 40, 320
    dec3 = jax.random.normal(k5, (N3, V3), dtype=jnp.float32)
    lbl3 = jax.random.randint(k6, (N3,), 0, V3, dtype=jnp.int32)
    lbl3_nll = lbl3.at[5].set(_IGNORE_INDEX)

    loss3_s = jax.block_until_ready(
        nmt_criterion_loss(dec3, lbl3, label_smoothing=0.1, tm=16, tv=128))
    ref3_s = _reference_loss(dec3, lbl3, 0.1)
    assert jnp.allclose(loss3_s, ref3_s, rtol=1e-4, atol=1e-3), (loss3_s, ref3_s)

    loss3_n = jax.block_until_ready(
        nmt_criterion_loss(dec3, lbl3_nll, label_smoothing=0.0, tm=16, tv=128))
    ref3_n = _reference_loss(dec3, lbl3_nll, 0.0)
    assert jnp.allclose(loss3_n, ref3_n, rtol=1e-4, atol=1e-3), (loss3_n, ref3_n)

    print("KERNEL_OK")
</pallas_src>

<mosaic_0001>
module attributes {stable_mosaic.version = 11 : i64} {
  func.func @_nmt_loss_kernel(%arg0: i32, %arg1: i32, %arg2: i32, %arg3: memref<16x128xf32, #tpu.memory_space<vmem>>, %arg4: memref<16x1xi32, #tpu.memory_space<vmem>>, %arg5: memref<1x1xf32, #tpu.memory_space<vmem>>, %arg6: memref<16x1xf32, #tpu.memory_space<vmem>>, %arg7: memref<16x1xf32, #tpu.memory_space<vmem>>, %arg8: memref<16x1xf32, #tpu.memory_space<vmem>>, %arg9: memref<16x1xf32, #tpu.memory_space<vmem>>) attributes {dimension_semantics = [#tpu.dimension_semantics<parallel>, #tpu.dimension_semantics<arbitrary>, #tpu.dimension_semantics<arbitrary>], iteration_bounds = array<i64: 1, 1, 1>, scalar_prefetch = 0 : i64, scratch_operands = 4 : i64, tpu.core_type = #tpu.core_type<tc>, window_params = [{transform_indices = @transform_0, window_bounds = array<i64: 16, 128>}, {transform_indices = @transform_1, window_bounds = array<i64: 16, 1>}, {transform_indices = @transform_2, window_bounds = array<i64: 1, 1>}]} {
    %c0_i32 = arith.constant 0 : i32
    %0 = arith.cmpi eq, %arg1, %c0_i32 : i32
    %c0_i32_0 = arith.constant 0 : i32
    %1 = arith.cmpi eq, %arg2, %c0_i32_0 : i32
    %2 = arith.andi %0, %1 : i1
    %3 = arith.extui %2 : i1 to i32
    %c0_i32_1 = arith.constant 0 : i32
    %4 = arith.cmpi ne, %3, %c0_i32_1 : i32
    scf.if %4 {
      %cst_28 = arith.constant 0.000000e+00 : f32
      %46 = vector.broadcast %cst_28 : f32 to vector<16x1xf32>
      %c0_29 = arith.constant 0 : index
      %c0_30 = arith.constant 0 : index
      %47 = vector.load %arg9[%c0_29, %c0_30] : memref<16x1xf32, #tpu.memory_space<vmem>>, vector<16x1xf32>
      tpu.vector_store %arg9[%c0_29, %c0_30], %46 {strides = array<i32>} : memref<16x1xf32, #tpu.memory_space<vmem>>, vector<16x1xf32>,
    } else {
    }
    %c0_i32_2 = arith.constant 0 : i32
    %5 = arith.cmpi eq, %arg2, %c0_i32_2 : i32
    %6 = arith.extui %5 : i1 to i32
    %c0_i32_3 = arith.constant 0 : i32
    %7 = arith.cmpi ne, %6, %c0_i32_3 : i32
    scf.if %7 {
      %cst_28 = arith.constant 0xFF800000 : f32
      %46 = vector.broadcast %cst_28 : f32 to vector<16x1xf32>
      %c0_29 = arith.constant 0 : index
      %c0_30 = arith.constant 0 : index
      %47 = vector.load %arg6[%c0_29, %c0_30] : memref<16x1xf32, #tpu.memory_space<vmem>>, vector<16x1xf32>
      tpu.vector_store %arg6[%c0_29, %c0_30], %46 {strides = array<i32>} : memref<16x1xf32, #tpu.memory_space<vmem>>, vector<16x1xf32>,
      %cst_31 = arith.constant 0.000000e+00 : f32
      %48 = vector.broadcast %cst_31 : f32 to vector<16x1xf32>
      %c0_32 = arith.constant 0 : index
      %c0_33 = arith.constant 0 : index
      %49 = vector.load %arg7[%c0_32, %c0_33] : memref<16x1xf32, #tpu.memory_space<vmem>>, vector<16x1xf32>
      tpu.vector_store %arg7[%c0_32, %c0_33], %48 {strides = array<i32>} : memref<16x1xf32, #tpu.memory_space<vmem>>, vector<16x1xf32>,
      %cst_34 = arith.constant 0.000000e+00 : f32
      %50 = vector.broadcast %cst_34 : f32 to vector<16x1xf32>
      %c0_35 = arith.constant 0 : index
      %c0_36 = arith.constant 0 : index
      %51 = vector.load %arg8[%c0_35, %c0_36] : memref<16x1xf32, #tpu.memory_space<vmem>>, vector<16x1xf32>
      tpu.vector_store %arg8[%c0_35, %c0_36], %50 {strides = array<i32>} : memref<16x1xf32, #tpu.memory_space<vmem>>, vector<16x1xf32>,
    } else {
    }
    %c0 = arith.constant 0 : index
    %c0_4 = arith.constant 0 : index
    %8 = vector.load %arg3[%c0, %c0_4] : memref<16x128xf32, #tpu.memory_space<vmem>>, vector<16x128xf32>
    %c0_5 = arith.constant 0 : index
    %c0_6 = arith.constant 0 : index
    %9 = vector.load %arg4[%c0_5, %c0_6] : memref<16x1xi32, #tpu.memory_space<vmem>>, vector<16x1xi32>
    %10 = tpu.iota {dimensions = array<i32: 1>} : vector<16x128xi32>
    %11 = vector.broadcast %9 : vector<16x1xi32> to vector<16x128xi32>
    %12 = arith.cmpi eq, %10, %11 : vector<16x128xi32>
    %cst = arith.constant dense<0xFF800000> : vector<16xf32>
    %13 = vector.multi_reduction <maximumf>, %8, %cst [1] : vector<16x128xf32> to vector<16xf32>
    %14 = vector.shape_cast %13 : vector<16xf32> to vector<16x1xf32>
    %c0_7 = arith.constant 0 : index
    %c0_8 = arith.constant 0 : index
    %15 = vector.load %arg6[%c0_7, %c0_8] : memref<16x1xf32, #tpu.memory_space<vmem>>, vector<16x1xf32>
    %16 = arith.maximumf %15, %14 : vector<16x1xf32>
    %17 = vector.broadcast %16 : vector<16x1xf32> to vector<16x128xf32>
    %18 = arith.subf %8, %17 : vector<16x128xf32>
    %19 = math.exp %18 : vector<16x128xf32>
    %c0_9 = arith.constant 0 : index
    %c0_10 = arith.constant 0 : index
    %20 = vector.load %arg7[%c0_9, %c0_10] : memref<16x1xf32, #tpu.memory_space<vmem>>, vector<16x1xf32>
    %21 = arith.subf %15, %16 : vector<16x1xf32>
    %22 = math.exp %21 : vector<16x1xf32>
    %23 = arith.mulf %20, %22 : vector<16x1xf32>
    %cst_11 = arith.constant dense<0.000000e+00> : vector<16xf32>
    %24 = vector.multi_reduction <add>, %19, %cst_11 [1] : vector<16x128xf32> to vector<16xf32>
    %25 = vector.shape_cast %24 : vector<16xf32> to vector<16x1xf32>
    %26 = arith.addf %23, %25 : vector<16x1xf32>
    %c0_12 = arith.constant 0 : index
    %c0_13 = arith.constant 0 : index
    %27 = vector.load %arg7[%c0_12, %c0_13] : memref<16x1xf32, #tpu.memory_space<vmem>>, vector<16x1xf32>
    tpu.vector_store %arg7[%c0_12, %c0_13], %26 {strides = array<i32>} : memref<16x1xf32, #tpu.memory_space<vmem>>, vector<16x1xf32>,
    %c0_14 = arith.constant 0 : index
    %c0_15 = arith.constant 0 : index
    %28 = vector.load %arg6[%c0_14, %c0_15] : memref<16x1xf32, #tpu.memory_space<vmem>>, vector<16x1xf32>
    tpu.vector_store %arg6[%c0_14, %c0_15], %16 {strides = array<i32>} : memref<16x1xf32, #tpu.memory_space<vmem>>, vector<16x1xf32>,
    %cst_16 = arith.constant 0.899999976 : f32
    %cst_17 = arith.constant 7.87401571E-4 : f32
    %29 = vector.broadcast %cst_16 : f32 to vector<16x128xf32>
    %30 = vector.broadcast %cst_17 : f32 to vector<16x128xf32>
    %31 = arith.select %12, %29, %30 : vector<16x128xi1>, vector<16x128xf32>
    %32 = arith.mulf %8, %31 : vector<16x128xf32>
    %c0_18 = arith.constant 0 : index
    %c0_19 = arith.constant 0 : index
    %33 = vector.load %arg8[%c0_18, %c0_19] : memref<16x1xf32, #tpu.memory_space<vmem>>, vector<16x1xf32>
    %cst_20 = arith.constant dense<0.000000e+00> : vector<16xf32>
    %34 = vector.multi_reduction <add>, %32, %cst_20 [1] : vector<16x128xf32> to vector<16xf32>
    %35 = vector.shape_cast %34 : vector<16xf32> to vector<16x1xf32>
    %36 = arith.addf %33, %35 : vector<16x1xf32>
    %c0_21 = arith.constant 0 : index
    %c0_22 = arith.constant 0 : index
    %37 = vector.load %arg8[%c0_21, %c0_22] : memref<16x1xf32, #tpu.memory_space<vmem>>, vector<16x1xf32>
    tpu.vector_store %arg8[%c0_21, %c0_22], %36 {strides = array<i32>} : memref<16x1xf32, #tpu.memory_space<vmem>>, vector<16x1xf32>,
    %c0_i32_23 = arith.constant 0 : i32
    %38 = arith.cmpi eq, %arg2, %c0_i32_23 : i32
    %39 = arith.extui %38 : i1 to i32
    %c0_i32_24 = arith.constant 0 : i32
    %40 = arith.cmpi ne, %39, %c0_i32_24 : i32
    scf.if %40 {
      %c0_28 = arith.constant 0 : index
      %c0_29 = arith.constant 0 : index
      %46 = vector.load %arg7[%c0_28, %c0_29] : memref<16x1xf32, #tpu.memory_space<vmem>>, vector<16x1xf32>
      %47 = math.log %46 : vector<16x1xf32>
      %c0_30 = arith.constant 0 : index
      %c0_31 = arith.constant 0 : index
      %48 = vector.load %arg6[%c0_30, %c0_31] : memref<16x1xf32, #tpu.memory_space<vmem>>, vector<16x1xf32>
      %49 = arith.addf %47, %48 : vector<16x1xf32>
      %50 = tpu.iota {dimensions = array<i32: 0>} : vector<16x1xi32>
      %c1_i32 = arith.constant 1 : i32
      %51 = arith.muli %arg0, %c1_i32 : i32
      %52 = arith.addi %51, %arg1 : i32
      %c16_i32 = arith.constant 16 : i32
      %53 = arith.muli %52, %c16_i32 : i32
      %54 = vector.broadcast %53 : i32 to vector<16x1xi32>
      %55 = arith.addi %54, %50 : vector<16x1xi32>
      %c16_i32_32 = arith.constant 16 : i32
      %56 = vector.broadcast %c16_i32_32 : i32 to vector<16x1xi32>
      %57 = arith.cmpi slt, %55, %56 : vector<16x1xi32>
      %cst_33 = arith.constant -0.809501707 : f32
      %58 = vector.broadcast %cst_33 : f32 to vector<16x1xf32>
      %59 = arith.addf %58, %49 : vector<16x1xf32>
      %c0_34 = arith.constant 0 : index
      %c0_35 = arith.constant 0 : index
      %60 = vector.load %arg8[%c0_34, %c0_35] : memref<16x1xf32, #tpu.memory_space<vmem>>, vector<16x1xf32>
      %61 = arith.subf %59, %60 : vector<16x1xf32>
      %cst_36 = arith.constant 0.000000e+00 : f32
      %62 = vector.broadcast %cst_36 : f32 to vector<16x1xf32>
      %63 = arith.select %57, %61, %62 : vector<16x1xi1>, vector<16x1xf32>
      %c0_37 = arith.constant 0 : index
      %c0_38 = arith.constant 0 : index
      %64 = vector.load %arg9[%c0_37, %c0_38] : memref<16x1xf32, #tpu.memory_space<vmem>>, vector<16x1xf32>
      %65 = arith.addf %64, %63 : vector<16x1xf32>
      %c0_39 = arith.constant 0 : index
      %c0_40 = arith.constant 0 : index
      %66 = vector.load %arg9[%c0_39, %c0_40] : memref<16x1xf32, #tpu.memory_space<vmem>>, vector<16x1xf32>
      tpu.vector_store %arg9[%c0_39, %c0_40], %65 {strides = array<i32>} : memref<16x1xf32, #tpu.memory_space<vmem>>, vector<16x1xf32>,
    } else {
    }
    %c0_i32_25 = arith.constant 0 : i32
    %41 = arith.cmpi eq, %arg1, %c0_i32_25 : i32
    %c0_i32_26 = arith.constant 0 : i32
    %42 = arith.cmpi eq, %arg2, %c0_i32_26 : i32
    %43 = arith.andi %41, %42 : i1
    %44 = arith.extui %43 : i1 to i32
    %c0_i32_27 = arith.constant 0 : i32
    %45 = arith.cmpi ne, %44, %c0_i32_27 : i32
    scf.if %45 {
      %c0_28 = arith.constant 0 : index
      %c0_29 = arith.constant 0 : index
      %46 = vector.load %arg9[%c0_28, %c0_29] : memref<16x1xf32, #tpu.memory_space<vmem>>, vector<16x1xf32>
      %47 = vector.shape_cast %46 : vector<16x1xf32> to vector<1x16x1xf32>
      %cst_30 = arith.constant dense<0.000000e+00> : vector<1xf32>
      %48 = vector.multi_reduction <add>, %47, %cst_30 [1, 2] : vector<1x16x1xf32> to vector<1xf32>
      %49 = vector.shape_cast %48 : vector<1xf32> to vector<1x1x1xf32>
      %50 = vector.extract %49[0, 0, 0] : f32 from vector<1x1x1xf32>
      %51 = vector.broadcast %50 : f32 to vector<1x1xf32>
      %c0_31 = arith.constant 0 : index
      %c0_32 = arith.constant 0 : index
      %52 = vector.load %arg5[%c0_31, %c0_32] : memref<1x1xf32, #tpu.memory_space<vmem>>, vector<1x1xf32>
      tpu.vector_store %arg5[%c0_31, %c0_32], %51 {strides = array<i32>} : memref<1x1xf32, #tpu.memory_space<vmem>>, vector<1x1xf32>,
    } else {
    }
    return
  }
  func.func @transform_0(%arg0: i32, %arg1: i32, %arg2: i32) -> (i32, i32) {
    %c1_i32 = arith.constant 1 : i32
    %0 = arith.muli %arg0, %c1_i32 : i32
    %1 = arith.addi %0, %arg1 : i32
    %c0_i32 = arith.constant 0 : i32
    %2 = arith.minsi %1, %c0_i32 : i32
    %c0_i32_0 = arith.constant 0 : i32
    return %2, %arg2 : i32, i32
  }
  func.func @transform_1(%arg0: i32, %arg1: i32, %arg2: i32) -> (i32, i32) {
    %c1_i32 = arith.constant 1 : i32
    %0 = arith.muli %arg0, %c1_i32 : i32
    %1 = arith.addi %0, %arg1 : i32
    %c0_i32 = arith.constant 0 : i32
    %2 = arith.minsi %1, %c0_i32 : i32
    %c0_i32_0 = arith.constant 0 : i32
    %c0_i32_1 = arith.constant 0 : i32
    return %2, %c0_i32_0 : i32, i32
  }
  func.func @transform_2(%arg0: i32, %arg1: i32, %arg2: i32) -> (i32, i32) {
    %c0_i32 = arith.constant 0 : i32
    %c0_i32_0 = arith.constant 0 : i32
    return %arg0, %c0_i32 : i32, i32
  }
}

</mosaic_0001>

<bundles_post_ra>
// kernel: tpu_custom_call.1
= control target key start
LH: loop header
LB: loop body
LE: loop exit
PB: predicated region body
PF: predicated region fallthrough
CT: control target
= control target key end

     0   :  { %s357_s0 = inlined_call_operand.vmem [shape: f32[16,128], index: 0, kind: input, shape index: {}]   ;;  %s358_s1 = inlined_call_operand.vmem [shape: s32[16,1], index: 1, kind: input, shape index: {}]   ;;  %s359_s2 = inlined_call_operand.hbm [shape: f32[1,1], index: 2, kind: output, shape index: {}]  }
   0x1   :  { %v95_v0 = vld [vmem:[%s357_s0] sm:$0xff] }
   0x2   :  { %7 = vsyncpa [#allocation7], 0  ;;  %109 = vmax.xlane.f32.xlu0 %v95_v0  ;;  %v96_v1 = vld [vmem:[%s357_s0 + $0x8] sm:$0xff]  ;;  %vm82_vm0 = vcmask 7168   ;;  %v295_v2 = vmov -inf   ;;  %v296_v3 = vmov 0   ;;  %v99_v15 = vlaneseq }
   0x3   :  { %89 = vst.msk [vmem:[#allocation2] sm:$0xff] %vm82_vm0, %v295_v2  ;;  %90 = vst.msk [vmem:[#allocation2 + $0x8] sm:$0xff] %vm82_vm0, %v295_v2  ;;  %257 = vset.pattern.permute.xlu1 %v296_v3  ;;  %258 = vset.pattern.permute.xlu0 %v296_v3  ;;  %v297_v4 = vmov 0.0   ;;  %v97_v5 = vld [vmem:[%s358_s1] sm:$0xff]  ;;  %v98_v14 = vld [vmem:[%s358_s1 + $0x8] sm:$0xff]  ;;  %s299_s1 = smov [#allocation6]  }
   0x4   :  { %91 = vst.msk [vmem:[#allocation3] sm:$0xff] %vm82_vm0, %v297_v4  ;;  %83 = vst.msk [vmem:[#allocation5] sm:$0xff] %vm82_vm0, %v297_v4  ;;  %v100_v16 = vand.u32 127, %v99_v15  ;;  %v298_v18 = vmov 0.0007874016   ;;  %s230_s16 = sshll.u32 %s299_s1, 4  ;;  %s231_s16 = int_to_ptr.vmem [resolvable:$true] %s230_s16 }
   0x5   :  { %84 = vst.msk [vmem:[#allocation5 + $0x8] sm:$0xff] %vm82_vm0, %v297_v4  ;;  %92 = vst.msk [vmem:[#allocation3 + $0x8] sm:$0xff] %vm82_vm0, %v297_v4  ;;  %vm222_vm3 = vcmask 0   ;;  %s271_s18 = scalar_lea.vmem %s231_s16, 16  ;;  %s275_s19 = scalar_lea.vmem %s231_s16, 32 }
   0x6   :  { %111 = vmax.xlane.f32.xlu0 %v96_v1  ;;  %93 = vst.msk [vmem:[#allocation4] sm:$0xff] %vm82_vm0, %v297_v4  ;;  %94 = vst.msk [vmem:[#allocation4 + $0x8] sm:$0xff] %vm82_vm0, %v297_v4  ;;  %p272_p0 = scmp.ne.s32.totalorder %s231_s16, %s271_s18  ;;  %p276_p1 = scmp.lt.s32.totalorder %s231_s16, %s231_s16 }
   0x7   :  { %p277_p2 = scmp.lt.s32.totalorder %s275_s19, %s271_s18 }
   0x9   :  { %p278_p3 = por %p277_p2, %p276_p1 }
   0xa   :  { %v113_v6 = vld [vmem:[#allocation2] sm:$0xff]  ;;  %v114_v9 = vld [vmem:[#allocation2 + $0x8] sm:$0xff] }
   0xb   :  { %v133_v38 = vld [vmem:[#allocation3] sm:$0xff]  ;;  %p279_p4 = pnand %p278_p3, %p272_p0 }
   0xc   :  { %v134_v42 = vld [vmem:[#allocation3 + $0x8] sm:$0xff]  ;;  %v199_v61 = vld [vmem:[#allocation5] sm:$0xff] }
   0xd   :  { %v158_v33 = vld [vmem:[#allocation4] sm:$0xff]  ;;  %v159_v47 = vld [vmem:[#allocation4 + $0x8] sm:$0xff]  ;;  %v200_v3 = vld [vmem:[#allocation5 + $0x8] sm:$0xff] }
  0x1c   :  { %102 = vperm.xlu0 %258, %v97_v5  }
  0x8f   :  { %v110_v7 = vpop.xlane.xlu0 %109 }
  0x90   :  { %v115_v8 = vmax.f32 %v113_v6, %v110_v7 }
  0x92   :  { %v135_v10 = vsub.f32 %v113_v6, %v115_v8  ;;  %152 = vst.msk [vmem:[#allocation2] sm:$0xff] %vm82_vm0, %v115_v8  ;;  %119 = vperm.xlu1 %257, %v115_v8  }
  0x93   :  { %v112_v11 = vpop.xlane.xlu0 %111 }
  0x94   :  { %v116_v12 = vmax.f32 %v114_v9, %v112_v11  ;;  %v137_v35 = vmul.f32 1.442695, %v135_v10 }
  0x96   :  { %v136_v13 = vsub.f32 %v114_v9, %v116_v12  ;;  %153 = vst.msk [vmem:[#allocation2 + $0x8] sm:$0xff] %vm82_vm0, %v116_v12  ;;  %124 = vperm.xlu1 %257, %v116_v12  }
  0x98   :  { %v139_v36 = vmul.f32 1.442695, %v136_v13 }
  0x99   :  { %v177_v54 = vld [vmem:[#allocation2] sm:$0xff] }
  0x9a   :  { %105 = vperm.xlu1 %257, %v98_v14  }
  0x9b   :  { %v103_v17 = vpop.permute.xlu0 %102 }
  0x9c   :  { %vm107_vm1 = vcmp.eq.s32.totalorder %v100_v16, %v103_v17 }
  0x9d   :  { %v154_v19 = vsel %vm107_vm1, 0.9, %v298_v18  ;;  %v178_v60 = vld [vmem:[#allocation2 + $0x8] sm:$0xff] }
  0x9e   :  { %v156_v20 = vmul.f32 %v154_v19, %v95_v0 }
  0xa0   :  { %160 = vadd.xlane.f32.xlu0 %v156_v20 }
 0x111   :  { %v120_v21 = vpop.permute.xlu1 %119 }
 0x112   :  { %v127_v22 = vsub.f32 %v95_v0, %v120_v21 }
 0x114   :  { %v129_v23 = vmul.f32 1.442695, %v127_v22 }
 0x115   :  { %v125_v24 = vpop.permute.xlu1 %124 }
 0x116   :  { %259 = vpow2.f32 %v129_v23  ;;  %v128_v25 = vsub.f32 %v96_v1, %v125_v24 }
 0x118   :  { %v131_v26 = vmul.f32 1.442695, %v128_v25 }
 0x119   :  { %v106_v27 = vpop.permute.xlu1 %105 }
 0x11a   :  { %261 = vpow2.f32 %v131_v26  ;;  %vm108_vm2 = vcmp.eq.s32.totalorder %v100_v16, %v106_v27 }
 0x11b   :  { %v155_v30 = vsel %vm108_vm2, 0.9, %v298_v18  ;;  %263 = vpow2.f32 %v137_v35 }
 0x11c   :  { %v157_v31 = vmul.f32 %v155_v30, %v96_v1  ;;  %265 = vpow2.f32 %v139_v36 }
 0x120   :  { %v260_v28 = vpop.eup %259 }
 0x121   :  { %143 = vadd.xlane.f32.xlu1 %v260_v28 }
 0x124   :  { %v262_v29 = vpop.eup %261 }
 0x125   :  { %145 = vadd.xlane.f32.xlu1 %v262_v29  ;;  %v264_v37 = vpop.eup %263 }
 0x126   :  { %v141_v39 = vmul.f32 %v264_v37, %v133_v38  ;;  %v266_v40 = vpop.eup %265 }
 0x127   :  { %v142_v44 = vmul.f32 %v266_v40, %v134_v42 }
 0x129   :  { %162 = vadd.xlane.f32.xlu1 %v157_v31 }
 0x12d   :  { %v161_v32 = vpop.xlane.xlu0 %160 }
 0x12e   :  { %v164_v34 = vadd.f32 %v161_v32, %v158_v33 }
 0x130   :  { %166 = vst.msk [vmem:[#allocation4] sm:$0xff] %vm82_vm0, %v164_v34 }
 0x137   :  { %v193_v57 = vld [vmem:[#allocation4] sm:$0xff] }
 0x1ae   :  { %v144_v41 = vpop.xlane.xlu1 %143 }
 0x1af   :  { %v147_v43 = vadd.f32 %v144_v41, %v141_v39 }
 0x1b1   :  { %150 = vst.msk [vmem:[#allocation3] sm:$0xff] %vm82_vm0, %v147_v43 }
 0x1b2   :  { %v146_v45 = vpop.xlane.xlu1 %145 }
 0x1b3   :  { %v148_v46 = vadd.f32 %v146_v45, %v142_v44 }
 0x1b5   :  { %151 = vst.msk [vmem:[#allocation3 + $0x8] sm:$0xff] %vm82_vm0, %v148_v46 }
 0x1b6   :  { %v163_v48 = vpop.xlane.xlu1 %162 }
 0x1b7   :  { %v165_v49 = vadd.f32 %v163_v48, %v159_v47 }
 0x1b8   :  { %v171_v50 = vld [vmem:[#allocation3] sm:$0xff] }
 0x1b9   :  { %267 = vlog2.f32 %v171_v50  ;;  %167 = vst.msk [vmem:[#allocation4 + $0x8] sm:$0xff] %vm82_vm0, %v165_v49 }
 0x1bc   :  { %v172_v51 = vld [vmem:[#allocation3 + $0x8] sm:$0xff] }
 0x1bd   :  { %269 = vlog2.f32 %v172_v51 }
 0x1c0   :  { %v194_v2 = vld [vmem:[#allocation4 + $0x8] sm:$0xff] }
 0x1c3   :  { %v268_v52 = vpop.eup %267 }
 0x1c4   :  { %v174_v53 = vmul.f32 0.6931472, %v268_v52 }
 0x1c6   :  { %v179_v55 = vadd.f32 %v177_v54, %v174_v53 }
 0x1c7   :  { %v270_v56 = vpop.eup %269 }
 0x1c8   :  { %v176_v58 = vmul.f32 0.6931472, %v270_v56  ;;  %v191_v59 = vadd.f32 -0.8095017, %v179_v55 }
 0x1ca   :  { %v180_v62 = vadd.f32 %v178_v60, %v176_v58  ;;  %v195_v63 = vsub.f32 %v191_v59, %v193_v57 }
 0x1cc   :  { %v192_v0 = vadd.f32 -0.8095017, %v180_v62  ;;  %v201_v1 = vadd.f32 %v199_v61, %v195_v63 }
 0x1ce   :  { %v196_v4 = vsub.f32 %v192_v0, %v194_v2  ;;  %203 = vst.msk [vmem:[#allocation5] sm:$0xff] %vm82_vm0, %v201_v1 }
 0x1d0   :  { %v202_v5 = vadd.f32 %v200_v3, %v196_v4 }
 0x1d2   :  { %204 = vst.msk [vmem:[#allocation5 + $0x8] sm:$0xff] %vm82_vm0, %v202_v5 }
 0x1d5   :  { %v207_v6 = vld [vmem:[#allocation5] sm:$0xff] }
 0x1d6   :  { %v209_v8 = vsel %vm82_vm0, %v207_v6, 0.0 }
 0x1d9   :  { %v208_v7 = vld [vmem:[#allocation5 + $0x8] sm:$0xff] }
 0x1da   :  { %v210_v9 = vsel %vm82_vm0, %v208_v7, 0.0 }
 0x1db   :  { %v211_v10 = vadd.f32 %v210_v9, %v209_v8 }
 0x1dd   :  { %212 = vadd.xlane.f32.xlu1 %v211_v10 }
 0x26a   :  { %v213_v11 = vpop.xlane.xlu1 %212 }
 0x26b   :  { %v214_v12 = vrot.slane %v213_v11, 4 }
 0x26d   :  { %v215_v13 = vadd.f32 %v214_v12, %v213_v11 }
 0x26f   :  { %v216_v14 = vrot.slane %v215_v13, 2 }
 0x271   :  { %v217_v15 = vadd.f32 %v216_v14, %v215_v13 }
 0x273   :  { %v218_v16 = vrot.slane %v217_v15, 1 }
 0x275   :  { %v219_v17 = vadd.f32 %v218_v16, %v217_v15 }
 0x277   :  { %250 = vpush %v219_v17 }
 0x2a8   :  { %s251_s17 = spop %250 }
 0x2a9   :  { %v221_v18 = vstv %s251_s17 }
 0x2aa   :  { %223 = vst.msk [vmem:[#allocation6] sm:$0x1] %vm222_vm3, %v221_v18 }
 0x2ab   :  { %282 = shalt.err (!%p279_p4)
}
 0x2ac   :  { %s283_s22 = scalar_lea.hbm %s359_s2, 16 }
 0x2ad   :  { %p284_p5 = scmp.ne.s32.totalorder %s359_s2, %s283_s22  ;;  %p287_p6 = scmp.lt.u32.totalorder %s283_s22, %s359_s2 }
 0x2af   :  { %p289_p7 = pnand %p287_p6, %p284_p5 }
 0x2b1   :  { %292 = shalt.err (!%p289_p7)
}
 0x2b2   :  { %233 = dma.vmem_to_hbm [thread:$0]  %s231_s16, 16, %s359_s2, [#allocation7]  }
 0x2b3   :  { %293 = dma.done.wait [#allocation7], 16  }
 0x2b4   :  { %294 = vsyncadd [#allocation7], 4294967280 }
 0x2b5   :  { %237 = vsyncpa [#allocation7], 1 }

</bundles_post_ra>
